<compile_context>
chip_gen: v6e
topology: v6e:2x2x1
jax: 0.10.0
libtpu: 0.0.40
codegen_flags: <defaults>
</compile_context>

<pallas_src>
import math
import functools

import jax
import jax.numpy as jnp
import numpy as np
from jax import lax
from jax.experimental import pallas as pl
from jax.experimental.pallas import tpu as pltpu


def _pick_q_tile(n, target=256):
    """Largest tile in {target, target/2, ...} >= 8 that divides n, else n."""
    if n <= target:
        return n
    t = target
    while t >= 8:
        if n % t == 0:
            return t
        t //= 2
    return n


def _attention_kernel(x_ref, wqkv_ref, bqkv_ref, wp_ref, bp_ref, out_ref, *rest,
                      heads, hd, return_attn, compute_dtype):
    # Grid step (b, qt):
    #   x_ref:    (1, N, C)            tokens for batch b (compute_dtype)
    #   wqkv_ref: (C, 3C)              fused qkv weights, q slab pre-scaled (bf16, resident)
    #   bqkv_ref: (1, 3C)              fused qkv bias, q slab pre-scaled (f32)
    #   wp_ref:   (C, C)               output projection (bf16, resident)
    #   bp_ref:   (1, C)               output projection bias (f32)
    #   out_ref:  (1, tq, C)           projected output for this query tile
    #   attn_ref: (1, H, tq, N)        attention weights strip (only if return_attn)
    #   qkv_ref:  (N, 3C) scratch      fused qkv activations for batch b (compute_dtype)
    if return_attn:
        attn_ref, qkv_ref = rest
    else:
        (qkv_ref,) = rest

    C = heads * hd
    N = qkv_ref.shape[0]
    tq = out_ref.shape[1]
    qt = pl.program_id(1)

    # Fused QKV projection once per batch element: output width 3C keeps the
    # MXU output lanes dense; result cached in VMEM for all q-tiles / heads.
    @pl.when(qt == 0)
    def _():
        xb = x_ref[0]                                                  # (N, C)
        qkv = jnp.dot(xb, wqkv_ref[...],
                      preferred_element_type=jnp.float32) + bqkv_ref[...]
        qkv_ref[...] = qkv.astype(qkv_ref.dtype)

    row0 = pl.multiple_of(qt * tq, tq)

    o_parts = []
    for h in range(heads):                 # static unroll -> all lane slices static
        q_h = qkv_ref[pl.ds(row0, tq), pl.ds(h * hd, hd)]              # (tq, hd)
        k_h = qkv_ref[:, pl.ds(C + h * hd, hd)]                        # (N, hd)
        v_h = qkv_ref[:, pl.ds(2 * C + h * hd, hd)]                    # (N, hd)

        # q @ k^T without materializing k^T (contract last dims on the MXU).
        s = lax.dot_general(q_h, k_h, (((1,), (1,)), ((), ())),
                            preferred_element_type=jnp.float32)        # (tq, N) f32

        # Numerically-stable softmax (f32 stats).
        m = jnp.max(s, axis=-1, keepdims=True)
        e = jnp.exp(s - m)
        den = jnp.sum(e, axis=-1, keepdims=True)

        if return_attn:
            a = e / den                     # exact reciprocal for the exposed weights
            attn_ref[0, h] = a.astype(attn_ref.dtype)
            o = jnp.dot(a.astype(compute_dtype), v_h,
                        preferred_element_type=jnp.float32)             # (tq, hd)
        else:
            # Deferred normalization: scale the (tq, hd) rows instead of the
            # (tq, N) weights; EUP approx reciprocal is effectively free.
            o = jnp.dot(e.astype(compute_dtype), v_h,
                        preferred_element_type=jnp.float32)
            o = o * pl.reciprocal(den, approx=True)
        o_parts.append(o.astype(compute_dtype))

    # Assemble (tq, C) and do ONE full-width output projection (K = C).
    y = jnp.concatenate(o_parts, axis=-1)                               # (tq, C)
    out_ref[0] = (jnp.dot(y, wp_ref[...], preferred_element_type=jnp.float32)
                  + bp_ref[...]).astype(out_ref.dtype)
    # proj_drop / attn_drop: identity (eval / p == 0)


def attention_forward(x, wqkv, bqkv, wp, bp, heads, *, return_attn=True,
                      attn_dtype=jnp.float32, compute_dtype=jnp.bfloat16,
                      q_tile_target=256):
    B, N, C = x.shape
    assert C % heads == 0
    hd = C // heads
    scale = hd ** (-0.5)

    # ---- Host-side one-time parameter prep -------------------------------
    # Fold the softmax scale into the q slab of Wqkv and its bias (removes the
    # in-kernel q * scale).  Weights stored bf16 (VMEM-resident for the whole
    # grid); biases stay f32.  Column order of Wqkv is already (3, heads, hd),
    # matching the PyTorch reshape(B, N, 3, heads, hd).
    col_scale = jnp.concatenate([jnp.full((C,), scale, jnp.float32),
                                 jnp.ones((2 * C,), jnp.float32)])
    wqkv_h = (wqkv.astype(jnp.float32) * col_scale[None, :]).astype(compute_dtype)
    bqkv_h = (bqkv.reshape(1, 3 * C).astype(jnp.float32) * col_scale[None, :])
    wp_h = wp.astype(compute_dtype)
    bp_h = bp.reshape(1, C).astype(jnp.float32)
    x_c = x.astype(compute_dtype)          # halves the x DMA

    tq = _pick_q_tile(N, q_tile_target)
    n_q_tiles = N // tq

    kernel = functools.partial(_attention_kernel, heads=heads, hd=hd,
                               return_attn=return_attn,
                               compute_dtype=compute_dtype)

    out_shapes = [jax.ShapeDtypeStruct((B, N, C), x.dtype)]
    out_specs = [pl.BlockSpec((1, tq, C), lambda b, qt: (b, qt, 0))]
    if return_attn:
        out_shapes.append(jax.ShapeDtypeStruct((B, heads, N, N), attn_dtype))
        out_specs.append(pl.BlockSpec((1, heads, tq, N), lambda b, qt: (b, 0, qt, 0)))

    grid_spec = pltpu.PrefetchScalarGridSpec(
        num_scalar_prefetch=0,
        grid=(B, n_q_tiles),
        in_specs=[
            pl.BlockSpec((1, N, C), lambda b, qt: (b, 0, 0)),      # x (fetched once per b)
            pl.BlockSpec((C, 3 * C), lambda b, qt: (0, 0)),        # Wqkv (resident)
            pl.BlockSpec((1, 3 * C), lambda b, qt: (0, 0)),        # qkv bias
            pl.BlockSpec((C, C), lambda b, qt: (0, 0)),            # Wp (resident)
            pl.BlockSpec((1, C), lambda b, qt: (0, 0)),            # proj bias
        ],
        out_specs=out_specs,
        scratch_shapes=[pltpu.VMEM((N, 3 * C), compute_dtype)],    # fused qkv cache
    )

    results = pl.pallas_call(
        kernel,
        out_shape=tuple(out_shapes),
        grid_spec=grid_spec,
        compiler_params=pltpu.CompilerParams(
            # q-tile axis is "arbitrary": the fused-QKV scratch is filled only
            # at qt == 0 and reused by later tiles of the same batch element.
            dimension_semantics=("parallel", "arbitrary"),
            vmem_limit_bytes=64 * 1024 * 1024,
        ),
    )(x_c, wqkv_h, bqkv_h, wp_h, bp_h)

    if return_attn:
        out, attn = results
        return out, attn
    out = results[0] if isinstance(results, (tuple, list)) else results
    return out, None


def _reference(x, wqkv, bqkv, wp, bp, heads):
    B, N, C = x.shape
    hd = C // heads
    scale = hd ** (-0.5)
    qkv = x @ wqkv + bqkv[0]                       # (B, N, 3C)
    qkv = qkv.reshape(B, N, 3, heads, hd).transpose(2, 0, 3, 1, 4)
    q, k, v = qkv[0], qkv[1], qkv[2]               # (B, H, N, hd)
    attn = jnp.einsum("bhnd,bhmd->bhnm", q, k) * scale
    attn = jax.nn.softmax(attn, axis=-1)
    y = jnp.einsum("bhnm,bhmd->bhnd", attn, v)
    y = y.transpose(0, 2, 1, 3).reshape(B, N, C)
    out = y @ wp + bp[0]
    return out, attn


if __name__ == "__main__":
    B, N, C, heads = 2, 8, 32, 4
    dropout = 0.0  # identity at inference

    key = jax.random.PRNGKey(0)
    kx, k1, k2, k3, k4 = jax.random.split(key, 5)

    x = jax.random.normal(kx, (B, N, C), dtype=jnp.float32)

    # Deterministic parameter init (uniform like PyTorch nn.Linear default).
    bound = 1.0 / math.sqrt(C)
    wqkv = jax.random.uniform(k1, (C, 3 * C), jnp.float32, -bound, bound)
    bqkv = jax.random.uniform(k2, (1, 3 * C), jnp.float32, -bound, bound)
    wp = jax.random.uniform(k3, (C, C), jnp.float32, -bound, bound)
    bp = jax.random.uniform(k4, (1, C), jnp.float32, -bound, bound)

    ref_out, ref_attn = _reference(x, wqkv, bqkv, wp, bp, heads)

    # Full module semantics: (x, attn) with f32 attention weights.
    out, attn = attention_forward(x, wqkv, bqkv, wp, bp, heads,
                                  return_attn=True, attn_dtype=jnp.float32)
    out = jax.block_until_ready(out)
    attn = jax.block_until_ready(attn)
    # bf16 MXU inputs loosen the tolerance vs. pure f32.
    assert np.allclose(np.asarray(out), np.asarray(ref_out), atol=3e-2), "output mismatch"
    assert np.allclose(np.asarray(attn), np.asarray(ref_attn), atol=3e-2), "attn mismatch"

    # Fast path: no attention-weights writeback, deferred normalization.
    out2, attn2 = attention_forward(x, wqkv, bqkv, wp, bp, heads, return_attn=False)
    out2 = jax.block_until_ready(out2)
    assert attn2 is None
    assert np.allclose(np.asarray(out2), np.asarray(ref_out), atol=3e-2), "fast-path mismatch"

    print("KERNEL_OK")
</pallas_src>

<mosaic_0001>
module attributes {stable_mosaic.version = 11 : i64} {
  func.func @_attention_kernel(%arg0: i32, %arg1: i32, %arg2: memref<1x8x32xbf16, #tpu.memory_space<vmem>>, %arg3: memref<32x96xbf16, #tpu.memory_space<vmem>>, %arg4: memref<1x96xf32, #tpu.memory_space<vmem>>, %arg5: memref<32x32xbf16, #tpu.memory_space<vmem>>, %arg6: memref<1x32xf32, #tpu.memory_space<vmem>>, %arg7: memref<1x8x32xf32, #tpu.memory_space<vmem>>, %arg8: memref<1x4x8x8xf32, #tpu.memory_space<vmem>>, %arg9: memref<8x96xbf16, #tpu.memory_space<vmem>>) attributes {dimension_semantics = [#tpu.dimension_semantics<parallel>, #tpu.dimension_semantics<arbitrary>], iteration_bounds = array<i64: 2, 1>, scalar_prefetch = 0 : i64, scratch_operands = 1 : i64, tpu.core_type = #tpu.core_type<tc>, window_params = [{transform_indices = @transform_0, window_bounds = array<i64: 1, 8, 32>}, {pipeline_mode = #tpu.pipeline_mode<synchronous>, transform_indices = @transform_1, window_bounds = array<i64: 32, 96>}, {pipeline_mode = #tpu.pipeline_mode<synchronous>, transform_indices = @transform_2, window_bounds = array<i64: 1, 96>}, {pipeline_mode = #tpu.pipeline_mode<synchronous>, transform_indices = @transform_3, window_bounds = array<i64: 32, 32>}, {pipeline_mode = #tpu.pipeline_mode<synchronous>, transform_indices = @transform_4, window_bounds = array<i64: 1, 32>}, {transform_indices = @transform_5, window_bounds = array<i64: 1, 8, 32>}, {transform_indices = @transform_6, window_bounds = array<i64: 1, 4, 8, 8>}]} {
    %c0_i32 = arith.constant 0 : i32
    %0 = arith.cmpi eq, %arg1, %c0_i32 : i32
    %1 = arith.extui %0 : i1 to i32
    %c0_i32_0 = arith.constant 0 : i32
    %2 = arith.cmpi ne, %1, %c0_i32_0 : i32
    scf.if %2 {
      %c0_45 = arith.constant 0 : index
      %c0_46 = arith.constant 0 : index
      %c0_47 = arith.constant 0 : index
      %94 = vector.load %arg2[%c0_45, %c0_46, %c0_47] : memref<1x8x32xbf16, #tpu.memory_space<vmem>>, vector<1x8x32xbf16>
      %95 = vector.shape_cast %94 : vector<1x8x32xbf16> to vector<8x32xbf16>
      %c0_48 = arith.constant 0 : index
      %c0_49 = arith.constant 0 : index
      %96 = vector.load %arg3[%c0_48, %c0_49] : memref<32x96xbf16, #tpu.memory_space<vmem>>, vector<32x96xbf16>
      %cst_50 = arith.constant dense<0.000000e+00> : vector<8x96xf32>
      %97 = tpu.matmul %95, %96, %cst_50 {dimension_numbers = #tpu.dot_dimension_numbers<[1], [0], [0], [1], [0, 0, 1, 1], [], []>} : vector<8x32xbf16>, vector<32x96xbf16>, vector<8x96xf32> -> vector<8x96xf32>
      %c0_51 = arith.constant 0 : index
      %c0_52 = arith.constant 0 : index
      %98 = vector.load %arg4[%c0_51, %c0_52] : memref<1x96xf32, #tpu.memory_space<vmem>>, vector<1x96xf32>
      %99 = vector.broadcast %98 : vector<1x96xf32> to vector<8x96xf32>
      %100 = arith.addf %97, %99 : vector<8x96xf32>
      %101 = arith.truncf %100 : vector<8x96xf32> to vector<8x96xbf16>
      %c0_53 = arith.constant 0 : index
      %c0_54 = arith.constant 0 : index
      %102 = vector.load %arg9[%c0_53, %c0_54] : memref<8x96xbf16, #tpu.memory_space<vmem>>, vector<8x96xbf16>
      tpu.vector_store %arg9[%c0_53, %c0_54], %101 {strides = array<i32>} : memref<8x96xbf16, #tpu.memory_space<vmem>>, vector<8x96xbf16>,
    } else {
    }
    %c8_i32 = arith.constant 8 : i32
    %3 = arith.muli %arg1, %c8_i32 : i32
    %4 = tpu.assume_multiple %3, 8 : i32
    %5 = arith.index_cast %4 : i32 to index
    %c0 = arith.constant 0 : index
    %6 = vector.load %arg9[%5, %c0] : memref<8x96xbf16, #tpu.memory_space<vmem>>, vector<8x8xbf16>
    %c0_1 = arith.constant 0 : index
    %c32 = arith.constant 32 : index
    %7 = vector.load %arg9[%c0_1, %c32] : memref<8x96xbf16, #tpu.memory_space<vmem>>, vector<8x8xbf16>
    %c0_2 = arith.constant 0 : index
    %c64 = arith.constant 64 : index
    %8 = vector.load %arg9[%c0_2, %c64] : memref<8x96xbf16, #tpu.memory_space<vmem>>, vector<8x8xbf16>
    %cst = arith.constant dense<0.000000e+00> : vector<8x8xf32>
    %9 = tpu.matmul %6, %7, %cst {dimension_numbers = #tpu.dot_dimension_numbers<[1], [1], [0], [0], [0, 0, 1, 0], [], []>} : vector<8x8xbf16>, vector<8x8xbf16>, vector<8x8xf32> -> vector<8x8xf32>
    %cst_3 = arith.constant dense<0xFF800000> : vector<8xf32>
    %10 = vector.multi_reduction <maximumf>, %9, %cst_3 [1] : vector<8x8xf32> to vector<8xf32>
    %11 = vector.shape_cast %10 : vector<8xf32> to vector<8x1xf32>
    %12 = vector.broadcast %11 : vector<8x1xf32> to vector<8x8xf32>
    %13 = arith.subf %9, %12 : vector<8x8xf32>
    %14 = math.exp %13 : vector<8x8xf32>
    %cst_4 = arith.constant dense<0.000000e+00> : vector<8xf32>
    %15 = vector.multi_reduction <add>, %14, %cst_4 [1] : vector<8x8xf32> to vector<8xf32>
    %16 = vector.shape_cast %15 : vector<8xf32> to vector<8x1xf32>
    %17 = vector.broadcast %16 : vector<8x1xf32> to vector<8x8xf32>
    %18 = arith.divf %14, %17 : vector<8x8xf32>
    %c0_5 = arith.constant 0 : index
    %c0_6 = arith.constant 0 : index
    %c0_7 = arith.constant 0 : index
    %c0_8 = arith.constant 0 : index
    %19 = vector.load %arg8[%c0_5, %c0_6, %c0_7, %c0_8] : memref<1x4x8x8xf32, #tpu.memory_space<vmem>>, vector<1x1x8x8xf32>
    %20 = vector.shape_cast %19 : vector<1x1x8x8xf32> to vector<8x8xf32>
    %21 = vector.shape_cast %18 : vector<8x8xf32> to vector<1x1x8x8xf32>
    tpu.vector_store %arg8[%c0_5, %c0_6, %c0_7, %c0_8], %21 {strides = array<i32>} : memref<1x4x8x8xf32, #tpu.memory_space<vmem>>, vector<1x1x8x8xf32>,
    %22 = arith.truncf %18 : vector<8x8xf32> to vector<8x8xbf16>
    %cst_9 = arith.constant dense<0.000000e+00> : vector<8x8xf32>
    %23 = tpu.matmul %22, %8, %cst_9 {dimension_numbers = #tpu.dot_dimension_numbers<[1], [0], [0], [1], [0, 0, 1, 1], [], []>} : vector<8x8xbf16>, vector<8x8xbf16>, vector<8x8xf32> -> vector<8x8xf32>
    %24 = arith.truncf %23 : vector<8x8xf32> to vector<8x8xbf16>
    %25 = arith.index_cast %4 : i32 to index
    %c8 = arith.constant 8 : index
    %26 = vector.load %arg9[%25, %c8] : memref<8x96xbf16, #tpu.memory_space<vmem>>, vector<8x8xbf16>
    %c0_10 = arith.constant 0 : index
    %c40 = arith.constant 40 : index
    %27 = vector.load %arg9[%c0_10, %c40] : memref<8x96xbf16, #tpu.memory_space<vmem>>, vector<8x8xbf16>
    %c0_11 = arith.constant 0 : index
    %c72 = arith.constant 72 : index
    %28 = vector.load %arg9[%c0_11, %c72] : memref<8x96xbf16, #tpu.memory_space<vmem>>, vector<8x8xbf16>
    %cst_12 = arith.constant dense<0.000000e+00> : vector<8x8xf32>
    %29 = tpu.matmul %26, %27, %cst_12 {dimension_numbers = #tpu.dot_dimension_numbers<[1], [1], [0], [0], [0, 0, 1, 0], [], []>} : vector<8x8xbf16>, vector<8x8xbf16>, vector<8x8xf32> -> vector<8x8xf32>
    %cst_13 = arith.constant dense<0xFF800000> : vector<8xf32>
    %30 = vector.multi_reduction <maximumf>, %29, %cst_13 [1] : vector<8x8xf32> to vector<8xf32>
    %31 = vector.shape_cast %30 : vector<8xf32> to vector<8x1xf32>
    %32 = vector.broadcast %31 : vector<8x1xf32> to vector<8x8xf32>
    %33 = arith.subf %29, %32 : vector<8x8xf32>
    %34 = math.exp %33 : vector<8x8xf32>
    %cst_14 = arith.constant dense<0.000000e+00> : vector<8xf32>
    %35 = vector.multi_reduction <add>, %34, %cst_14 [1] : vector<8x8xf32> to vector<8xf32>
    %36 = vector.shape_cast %35 : vector<8xf32> to vector<8x1xf32>
    %37 = vector.broadcast %36 : vector<8x1xf32> to vector<8x8xf32>
    %38 = arith.divf %34, %37 : vector<8x8xf32>
    %c0_15 = arith.constant 0 : index
    %c1 = arith.constant 1 : index
    %c0_16 = arith.constant 0 : index
    %c0_17 = arith.constant 0 : index
    %39 = vector.load %arg8[%c0_15, %c1, %c0_16, %c0_17] : memref<1x4x8x8xf32, #tpu.memory_space<vmem>>, vector<1x1x8x8xf32>
    %40 = vector.shape_cast %39 : vector<1x1x8x8xf32> to vector<8x8xf32>
    %41 = vector.shape_cast %38 : vector<8x8xf32> to vector<1x1x8x8xf32>
    tpu.vector_store %arg8[%c0_15, %c1, %c0_16, %c0_17], %41 {strides = array<i32>} : memref<1x4x8x8xf32, #tpu.memory_space<vmem>>, vector<1x1x8x8xf32>,
    %42 = arith.truncf %38 : vector<8x8xf32> to vector<8x8xbf16>
    %cst_18 = arith.constant dense<0.000000e+00> : vector<8x8xf32>
    %43 = tpu.matmul %42, %28, %cst_18 {dimension_numbers = #tpu.dot_dimension_numbers<[1], [0], [0], [1], [0, 0, 1, 1], [], []>} : vector<8x8xbf16>, vector<8x8xbf16>, vector<8x8xf32> -> vector<8x8xf32>
    %44 = arith.truncf %43 : vector<8x8xf32> to vector<8x8xbf16>
    %45 = arith.index_cast %4 : i32 to index
    %c16 = arith.constant 16 : index
    %46 = vector.load %arg9[%45, %c16] : memref<8x96xbf16, #tpu.memory_space<vmem>>, vector<8x8xbf16>
    %c0_19 = arith.constant 0 : index
    %c48 = arith.constant 48 : index
    %47 = vector.load %arg9[%c0_19, %c48] : memref<8x96xbf16, #tpu.memory_space<vmem>>, vector<8x8xbf16>
    %c0_20 = arith.constant 0 : index
    %c80 = arith.constant 80 : index
    %48 = vector.load %arg9[%c0_20, %c80] : memref<8x96xbf16, #tpu.memory_space<vmem>>, vector<8x8xbf16>
    %cst_21 = arith.constant dense<0.000000e+00> : vector<8x8xf32>
    %49 = tpu.matmul %46, %47, %cst_21 {dimension_numbers = #tpu.dot_dimension_numbers<[1], [1], [0], [0], [0, 0, 1, 0], [], []>} : vector<8x8xbf16>, vector<8x8xbf16>, vector<8x8xf32> -> vector<8x8xf32>
    %cst_22 = arith.constant dense<0xFF800000> : vector<8xf32>
    %50 = vector.multi_reduction <maximumf>, %49, %cst_22 [1] : vector<8x8xf32> to vector<8xf32>
    %51 = vector.shape_cast %50 : vector<8xf32> to vector<8x1xf32>
    %52 = vector.broadcast %51 : vector<8x1xf32> to vector<8x8xf32>
    %53 = arith.subf %49, %52 : vector<8x8xf32>
    %54 = math.exp %53 : vector<8x8xf32>
    %cst_23 = arith.constant dense<0.000000e+00> : vector<8xf32>
    %55 = vector.multi_reduction <add>, %54, %cst_23 [1] : vector<8x8xf32> to vector<8xf32>
    %56 = vector.shape_cast %55 : vector<8xf32> to vector<8x1xf32>
    %57 = vector.broadcast %56 : vector<8x1xf32> to vector<8x8xf32>
    %58 = arith.divf %54, %57 : vector<8x8xf32>
    %c0_24 = arith.constant 0 : index
    %c2 = arith.constant 2 : index
    %c0_25 = arith.constant 0 : index
    %c0_26 = arith.constant 0 : index
    %59 = vector.load %arg8[%c0_24, %c2, %c0_25, %c0_26] : memref<1x4x8x8xf32, #tpu.memory_space<vmem>>, vector<1x1x8x8xf32>
    %60 = vector.shape_cast %59 : vector<1x1x8x8xf32> to vector<8x8xf32>
    %61 = vector.shape_cast %58 : vector<8x8xf32> to vector<1x1x8x8xf32>
    tpu.vector_store %arg8[%c0_24, %c2, %c0_25, %c0_26], %61 {strides = array<i32>} : memref<1x4x8x8xf32, #tpu.memory_space<vmem>>, vector<1x1x8x8xf32>,
    %62 = arith.truncf %58 : vector<8x8xf32> to vector<8x8xbf16>
    %cst_27 = arith.constant dense<0.000000e+00> : vector<8x8xf32>
    %63 = tpu.matmul %62, %48, %cst_27 {dimension_numbers = #tpu.dot_dimension_numbers<[1], [0], [0], [1], [0, 0, 1, 1], [], []>} : vector<8x8xbf16>, vector<8x8xbf16>, vector<8x8xf32> -> vector<8x8xf32>
    %64 = arith.truncf %63 : vector<8x8xf32> to vector<8x8xbf16>
    %65 = arith.index_cast %4 : i32 to index
    %c24 = arith.constant 24 : index
    %66 = vector.load %arg9[%65, %c24] : memref<8x96xbf16, #tpu.memory_space<vmem>>, vector<8x8xbf16>
    %c0_28 = arith.constant 0 : index
    %c56 = arith.constant 56 : index
    %67 = vector.load %arg9[%c0_28, %c56] : memref<8x96xbf16, #tpu.memory_space<vmem>>, vector<8x8xbf16>
    %c0_29 = arith.constant 0 : index
    %c88 = arith.constant 88 : index
    %68 = vector.load %arg9[%c0_29, %c88] : memref<8x96xbf16, #tpu.memory_space<vmem>>, vector<8x8xbf16>
    %cst_30 = arith.constant dense<0.000000e+00> : vector<8x8xf32>
    %69 = tpu.matmul %66, %67, %cst_30 {dimension_numbers = #tpu.dot_dimension_numbers<[1], [1], [0], [0], [0, 0, 1, 0], [], []>} : vector<8x8xbf16>, vector<8x8xbf16>, vector<8x8xf32> -> vector<8x8xf32>
    %cst_31 = arith.constant dense<0xFF800000> : vector<8xf32>
    %70 = vector.multi_reduction <maximumf>, %69, %cst_31 [1] : vector<8x8xf32> to vector<8xf32>
    %71 = vector.shape_cast %70 : vector<8xf32> to vector<8x1xf32>
    %72 = vector.broadcast %71 : vector<8x1xf32> to vector<8x8xf32>
    %73 = arith.subf %69, %72 : vector<8x8xf32>
    %74 = math.exp %73 : vector<8x8xf32>
    %cst_32 = arith.constant dense<0.000000e+00> : vector<8xf32>
    %75 = vector.multi_reduction <add>, %74, %cst_32 [1] : vector<8x8xf32> to vector<8xf32>
    %76 = vector.shape_cast %75 : vector<8xf32> to vector<8x1xf32>
    %77 = vector.broadcast %76 : vector<8x1xf32> to vector<8x8xf32>
    %78 = arith.divf %74, %77 : vector<8x8xf32>
    %c0_33 = arith.constant 0 : index
    %c3 = arith.constant 3 : index
    %c0_34 = arith.constant 0 : index
    %c0_35 = arith.constant 0 : index
    %79 = vector.load %arg8[%c0_33, %c3, %c0_34, %c0_35] : memref<1x4x8x8xf32, #tpu.memory_space<vmem>>, vector<1x1x8x8xf32>
    %80 = vector.shape_cast %79 : vector<1x1x8x8xf32> to vector<8x8xf32>
    %81 = vector.shape_cast %78 : vector<8x8xf32> to vector<1x1x8x8xf32>
    tpu.vector_store %arg8[%c0_33, %c3, %c0_34, %c0_35], %81 {strides = array<i32>} : memref<1x4x8x8xf32, #tpu.memory_space<vmem>>, vector<1x1x8x8xf32>,
    %82 = arith.truncf %78 : vector<8x8xf32> to vector<8x8xbf16>
    %cst_36 = arith.constant dense<0.000000e+00> : vector<8x8xf32>
    %83 = tpu.matmul %82, %68, %cst_36 {dimension_numbers = #tpu.dot_dimension_numbers<[1], [0], [0], [1], [0, 0, 1, 1], [], []>} : vector<8x8xbf16>, vector<8x8xbf16>, vector<8x8xf32> -> vector<8x8xf32>
    %84 = arith.truncf %83 : vector<8x8xf32> to vector<8x8xbf16>
    %85 = tpu.concatenate %24, %44, %64, %84 in 1 : vector<8x8xbf16>, vector<8x8xbf16>, vector<8x8xbf16>, vector<8x8xbf16> -> vector<8x32xbf16>
    %c0_37 = arith.constant 0 : index
    %c0_38 = arith.constant 0 : index
    %86 = vector.load %arg5[%c0_37, %c0_38] : memref<32x32xbf16, #tpu.memory_space<vmem>>, vector<32x32xbf16>
    %cst_39 = arith.constant dense<0.000000e+00> : vector<8x32xf32>
    %87 = tpu.matmul %85, %86, %cst_39 {dimension_numbers = #tpu.dot_dimension_numbers<[1], [0], [0], [1], [0, 0, 1, 1], [], []>} : vector<8x32xbf16>, vector<32x32xbf16>, vector<8x32xf32> -> vector<8x32xf32>
    %c0_40 = arith.constant 0 : index
    %c0_41 = arith.constant 0 : index
    %88 = vector.load %arg6[%c0_40, %c0_41] : memref<1x32xf32, #tpu.memory_space<vmem>>, vector<1x32xf32>
    %89 = vector.broadcast %88 : vector<1x32xf32> to vector<8x32xf32>
    %90 = arith.addf %87, %89 : vector<8x32xf32>
    %c0_42 = arith.constant 0 : index
    %c0_43 = arith.constant 0 : index
    %c0_44 = arith.constant 0 : index
    %91 = vector.load %arg7[%c0_42, %c0_43, %c0_44] : memref<1x8x32xf32, #tpu.memory_space<vmem>>, vector<1x8x32xf32>
    %92 = vector.shape_cast %91 : vector<1x8x32xf32> to vector<8x32xf32>
    %93 = vector.shape_cast %90 : vector<8x32xf32> to vector<1x8x32xf32>
    tpu.vector_store %arg7[%c0_42, %c0_43, %c0_44], %93 {strides = array<i32>} : memref<1x8x32xf32, #tpu.memory_space<vmem>>, vector<1x8x32xf32>,
    return
  }
  func.func @transform_0(%arg0: i32, %arg1: i32) -> (i32, i32, i32) {
    %c0_i32 = arith.constant 0 : i32
    %c0_i32_0 = arith.constant 0 : i32
    %c0_i32_1 = arith.constant 0 : i32
    return %arg0, %c0_i32, %c0_i32_0 : i32, i32, i32
  }
  func.func @transform_1(%arg0: i32, %arg1: i32) -> (i32, i32) {
    %c0_i32 = arith.constant 0 : i32
    %c0_i32_0 = arith.constant 0 : i32
    %c0_i32_1 = arith.constant 0 : i32
    return %c0_i32, %c0_i32_0 : i32, i32
  }
  func.func @transform_2(%arg0: i32, %arg1: i32) -> (i32, i32) {
    %c0_i32 = arith.constant 0 : i32
    %c0_i32_0 = arith.constant 0 : i32
    %c0_i32_1 = arith.constant 0 : i32
    return %c0_i32, %c0_i32_0 : i32, i32
  }
  func.func @transform_3(%arg0: i32, %arg1: i32) -> (i32, i32) {
    %c0_i32 = arith.constant 0 : i32
    %c0_i32_0 = arith.constant 0 : i32
    %c0_i32_1 = arith.constant 0 : i32
    return %c0_i32, %c0_i32_0 : i32, i32
  }
  func.func @transform_4(%arg0: i32, %arg1: i32) -> (i32, i32) {
    %c0_i32 = arith.constant 0 : i32
    %c0_i32_0 = arith.constant 0 : i32
    %c0_i32_1 = arith.constant 0 : i32
    return %c0_i32, %c0_i32_0 : i32, i32
  }
  func.func @transform_5(%arg0: i32, %arg1: i32) -> (i32, i32, i32) {
    %c0_i32 = arith.constant 0 : i32
    %c0_i32_0 = arith.constant 0 : i32
    return %arg0, %arg1, %c0_i32 : i32, i32, i32
  }
  func.func @transform_6(%arg0: i32, %arg1: i32) -> (i32, i32, i32, i32) {
    %c0_i32 = arith.constant 0 : i32
    %c0_i32_0 = arith.constant 0 : i32
    %c0_i32_1 = arith.constant 0 : i32
    return %arg0, %c0_i32, %arg1, %c0_i32_0 : i32, i32, i32, i32
  }
}

</mosaic_0001>

<bundles_post_ra>
// kernel: tpu_custom_call.1
= control target key start
LH: loop header
LB: loop body
LE: loop exit
PB: predicated region body
PF: predicated region fallthrough
CT: control target
= control target key end

     0   :  { %s1977_s0 = inlined_call_operand.hbm [shape: bf16[2,8,32], index: 0, kind: input, shape index: {}]   ;;  %s1978_s1 = inlined_call_operand.hbm [shape: bf16[32,96], index: 1, kind: input, shape index: {}]   ;;  %s1979_s2 = inlined_call_operand.vmem [shape: f32[1,96], index: 2, kind: input, shape index: {}]   ;;  %s1980_s3 = inlined_call_operand.hbm [shape: bf16[32,32], index: 3, kind: input, shape index: {}]   ;;  %s1981_s4 = inlined_call_operand.vmem [shape: f32[1,32], index: 4, kind: input, shape index: {}]   ;;  %s1982_s5 = inlined_call_operand.hbm [shape: f32[2,8,32], index: 5, kind: output, shape index: {0}]   ;;  %s1983_s6 = inlined_call_operand.hbm [shape: f32[2,4,8,8], index: 6, kind: output, shape index: {1}]  }
   0x1   :  { %1987 = sst [smem:[#allocation16_spill]] %s1978_s1 }
   0x2   :  { %1988 = sst [smem:[#allocation17_spill]] %s1980_s3 }
   0x3   :  { %12 = vsyncpa [#allocation4], 0 }
   0x4   :  { %14 = vsyncpa [#allocation4 + $0x1], 0 }
   0x5   :  { %15 = vsyncpa [#allocation7], 0 }
   0x6   :  { %16 = vsyncpa [#allocation5], 0 }
   0x7   :  { %18 = vsyncpa [#allocation5 + $0x1], 0 }
   0x8   :  { %19 = vsyncpa [#allocation11], 0 }
   0x9   :  { %21 = vsyncpa [#allocation11 + $0x1], 0  ;;  %s1663_s21 = smov 0   ;;  %s1665_s22 = smov 0  }
   0xa   :  { %s1667_s23 = smov 0   ;;  %s1669_s24 = smov 0  }
   0xb   :  { %s1671_s25 = smov 0   ;;  %s1673_s26 = smov 0  }
   0xc LB: > { %s1140_s27 = sadd.s32 4294967295, %s1602_s26   ;;  %s1141_s28 = sadd.s32 4294967294, %s1602_s26   ;;  %s1602_s26 = sphi %s1673_s26, %s27_s26   ;;  %s1598_s25 = sphi %s1671_s25, %s2007_s25   ;;  %s1594_s24 = sphi %s1669_s24, %s2006_s24   ;;  %s1590_s23 = sphi %s1667_s23, %s2005_s23   ;;  %s1586_s22 = sphi %s1665_s22, %s2004_s22   ;;  %s1582_s21 = sphi %s1663_s21, %s2003_s21  }
   0xd   : > { %p59_p0 = scmp.ne.s32.totalorder %s1586_s22, %s1582_s21  ;;  %p1697_p1 = scmp.eq.s32.totalorder %s1140_s27, 0 }
   0xe   : > { %p1701_p2 = scmp.eq.s32.totalorder %s1140_s27, 1  ;;  %p175_p3 = scmp.eq.s32.totalorder %s1141_s28, 1 }
   0xf   : > { %s1989_s29 = scalar_select %p1697_p1, 1, 0 }
  0x10   : > { %p1707_p4 = por %p1697_p1, %p59_p0  ;;  %p1142_p5 = scmp.ge.s32.totalorder %s1602_s26, 1 }
  0x11   : > { %p1712_p6 = por %p175_p3, %p59_p0  ;;  %p210_p7 = scmp.lt.s32.totalorder %s1602_s26, 3 }
  0x12   : > { %s1991_s7 = scalar_select %p1707_p4, 1, 0 }
  0x13   : > { %s1992_s8 = scalar_select %p1712_p6, 1, 0 }
  0x14   : > { %p1717_p8 = pnand %p1142_p5, %p210_p7  ;;  %s1604_s10 = smov [#allocation6]  }
  0x15   : > { %s222_s11 = sshll.u32 %s1604_s10, 4  ;;  %s1605_s13 = smov [#allocation8]   ;;  %s223_s11 = int_to_ptr.vmem [resolvable:$true] %s222_s11 }
  0x16   : > { %p1288_p9 = pneg %p1717_p8  ;;  %s238_s14 = sshll.u32 %s1605_s13, 4  ;;  %s239_s14 = int_to_ptr.vmem [resolvable:$true] %s238_s14 }
  0x17   : > { %s1419_s15 = scalar_lea.vmem %s223_s11, 256  ;;  %p1427_p5 = scmp.lt.s32.totalorder %s223_s11, %s223_s11 }
  0x18   : > { %p1726_p11 = pnand %p1288_p9, %p1697_p1  ;;  %p1420_p13 = scmp.ne.s32.totalorder %s223_s11, %s1419_s15 }
  0x19   : > { %p1428_p7 = scmp.lt.s32.totalorder %s1419_s15, %s1419_s15 }
  0x1a   : > { %p1410_p12 = pneg %p1726_p11 }
  0x1b   : > { %p1429_p10 = por %p1428_p7, %p1427_p5 }
  0x1c   : > { %p1422_p0 = pnand %p1420_p13, %p1410_p12 }
  0x1e   : > { %p1423_p3 = pneg %p1422_p0 }
  0x20   : > { %p1430_p9 = pnand %p1429_p10, %p1423_p3 }
  0x22   : > { %1433 = shalt.err (!%p1430_p9)
}
  0x23   : > { %s1606_s16 = smov 64   ;;  %s1607_s17 = smov 4  }
  0x24   : > { %s1995_s1 = sld [smem:[#allocation16_spill]]  ;;  %s1445_s20 = scalar_lea.vmem %s239_s14, 256 }
  0x25   : > { %p1446_p6 = scmp.ne.s32.totalorder %s239_s14, %s1445_s20  ;;  %p1453_p1 = scmp.lt.s32.totalorder %s239_s14, %s239_s14 }
  0x26   : > { %p1454_p4 = scmp.lt.s32.totalorder %s1445_s20, %s1445_s20 }
  0x27   : > { %p1448_p13 = pnand %p1446_p6, %p1410_p12 }
  0x28   : > { %p1455_p5 = por %p1454_p4, %p1453_p1 }
  0x29   : > { %p1449_p0 = pneg %p1448_p13 }
  0x2a   : > { %1291 = dma.hbm_to_vmem [thread:$0]  (!%p1726_p11), %s1995_s1, 256, %s223_s11, [#allocation7], %s1606_s16, %s1606_s16, %s1607_s17  }
  0x2b   : > { %p1456_p10 = pnand %p1455_p5, %p1449_p0 }
  0x2d   : > { %1459 = shalt.err (!%p1456_p10)
}
  0x2e   : > { %s1996_s3 = sld [smem:[#allocation17_spill]]  ;;  %s39_s10 = sadd.s32 1, %s1598_s25 }
  0x2f   : > { %s46_s11 = sadd.s32 1, %s1590_s23  ;;  %p41_p1 = scmp.ge.s32.totalorder %s39_s10, 2 }
  0x30   : > { %p53_p4 = scmp.ne.s32.totalorder %s1590_s23, %s1586_s22  ;;  %p54_p6 = scmp.eq.s32.totalorder %s1602_s26, 0 }
  0x31   : > { %p1308_p12 = scmp.lt.s32.totalorder %s1602_s26, 2  ;;  %s2009_s10 = smov (%p41_p1, %s39_s10), 0 }
  0x32   : > { %p55_p3 = por %p54_p6, %p53_p4  ;;  %p1758_p7 = por %p1701_p2, %p53_p4 }
  0x33   : > { %s43_s13 = ssub.s32 %s1598_s25, %s2009_s10  ;;  %s255_s15 = sand.u32 1, %s1590_s23  }
  0x34   : > { %1294 = dma.hbm_to_vmem [thread:$0]  (!%p1726_p11), %s1996_s3, 256, %s239_s14, [#allocation7], %s1606_s16, %s1606_s16, %s1607_s17  }
  0x35   : > { %p44_p9 = scmp.eq.s32.totalorder %s43_s13, 0  ;;  %s1146_s14 = sshll.u32 %s255_s15, 2 }
  0x36   : > { %s1147_s16 = sshll.u32 %s1598_s25, 6  ;;  %s259_s27 = scalar_lea.vmem [#allocation3], %s1146_s14 }
  0x37   : > { %s1767_s17 = scalar_select %p44_p9, %s1590_s23, %s46_s11  }
  0x38   : > { %s264_s20 = scalar_lea.hbm %s1977_s0, %s1147_s16  ;;  %s266_s28 = sshll.u32 %s259_s27, 4  ;;  %s267_s28 = int_to_ptr.vmem [resolvable:$true] %s266_s28 }
  0x39   : > { %p1774_p11 = pnand %p1308_p12, %p55_p3  ;;  %s256_s1 = scalar_lea.sflag [#allocation4], %s255_s15 }
  0x3a   : > { %s1473_s13 = scalar_lea.vmem %s267_s28, 64  ;;  %s1608_s11 = smov [#allocation3]  }
  0x3b   : > { %p1462_p2 = pneg %p1774_p11  ;;  %p1474_p13 = scmp.ne.s32.totalorder %s267_s28, %s1473_s13 }
  0x3c   : > { %s1478_s3 = sshll.u32 %s1608_s11, 4  ;;  %s1479_s3 = int_to_ptr.vmem [resolvable:$false] %s1478_s3 }
  0x3d   : > { %p1476_p0 = pnand %p1474_p13, %p1462_p2  ;;  %s1480_s16 = scalar_lea.vmem %s1479_s3, 128 }
  0x3e   : > { %p1481_p10 = scmp.lt.s32.totalorder %s267_s28, %s1479_s3  ;;  %p1482_p1 = scmp.lt.s32.totalorder %s1480_s16, %s1473_s13 }
  0x3f   : > { %p1477_p5 = pneg %p1476_p0 }
  0x40   : > { %p1483_p4 = por %p1482_p1, %p1481_p10 }
  0x42   : > { %p1484_p6 = pnand %p1483_p4, %p1477_p5 }
  0x44   : > { %1487 = shalt.err (!%p1484_p6)
}
  0x45   : > { %1298 = dma.hbm_to_vmem [thread:$0]  (!%p1774_p11), %s264_s20, 64, %s267_s28, %s256_s1  }
  0x46   : > { %275 = sbr.rel (%p1717_p8) target bundleno = 1506 (0x5e2), region = 40  ;;  %s1785_s15 = sand.u32 (!%p1717_p8), 1, %s1586_s22  }
  0x47   : > { %s1149_s14 = sshll.u32 (!%p1717_p8), %s1785_s15, 2  ;;  %s278_s18 = scalar_lea.sflag (!%p1717_p8), [#allocation4], %s1785_s15 }
  0x48   : > { %s281_s19 = scalar_lea.vmem (!%p1717_p8), [#allocation3], %s1149_s14  ;;  %p1999_p12 = scmp.ne.s32.totalorder (!%p1717_p8), %s1991_s7, 0 }
  0x4b   : > { %1565 = dma.done.wait (%p1999_p12), %s278_s18, 64  }
  0x4c   : > { %1567 = vsyncadd (%p1999_p12), %s278_s18, 4294967232  ;;  %p2000_p3 = scmp.ne.s32.totalorder %s1989_s29, 0 }
  0x4e   : > { %1569 = dma.done.wait (%p2000_p3), [#allocation7], 512  }
  0x4f   : > { %1571 = vsyncadd (%p2000_p3), [#allocation7], 4294966784  ;;  %v1609_v0 = vmov 0.0   ;;  %vm1610_vm0 = vmmov 0   ;;  %v1381_v1 = vld [vmem:[#allocation6 + $0x8] sm:$0xff]   ;;  %v1382_v2 = vld [vmem:[#allocation6] sm:$0xff]  }
  0x50   : > { %1210 = vmatprep.subr.bf16.mxu0 %v1609_v0  ;;  %1214 = vmatprep.mubr.msk.bf16.mxu0 %vm1610_vm0, %v1609_v0  ;;  %v328_v3 = vld [vmem:[%s281_s19] sm:$0xf]  ;;  %vm352_vm1 = vcmask 261120   ;;  %v1154_v4 = vld [vmem:[%s1979_s2] ss:$0 sm:$0xff]  ;;  %vm397_vm2 = vcmask 781312  }
  0x51   : > { %1218 = vmatprep.subr.bf16.mxu1 %v1609_v0  ;;  %1220 = vmatprep.mubr.msk.bf16.mxu1 %vm1610_vm0, %v1609_v0  ;;  %s1611_s29 = smov 120   ;;  %s1612_s7 = smov 96   ;;  %vm411_vm3 = vcmask 64512   ;;  %vm476_vm4 = vcmask 1043456   ;;  %vm896_vm5 = vcmask 130048   ;;  %vm899_vm6 = vcmask 195584  }
  0x52   : > { %1211 = vmatpush3.bf16.msra.mxu0 %v1381_v1  ;;  %s1613_s9 = smov 80   ;;  %s1614_s20 = smov 88  }
  0x53   : > { %1212 = vmatprep.subr.bf16.mxu0 %v1609_v0  ;;  %s1615_s27 = smov 72   ;;  %s1616_s28 = smov 112  }
  0x54   : > { %s1617_s30 = smov 104   ;;  %s1618_s13 = smov 56  }
  0x55   : > { %s1619_s11 = smov 64   ;;  %s1620_s16 = smov 40  }
  0x56   : > { %1213 = vmatpush3.bf16.msra.mxu0 %v1382_v2  ;;  %s1621_s14 = smov 48   ;;  %s1153_s18 = sshll.u32 %s1785_s15, 5 }
  0x57   : > { %1224 = vmatprep.subr.bf16.mxu0 %v1609_v0  ;;  %s1856_s19 = scalar_lea.vmem [#allocation10], %s1153_s18  ;;  %s1622_s1 = smov 8  }
  0x58   : > { %s1623_s3 = smov 16  }
  0x59   : > { %1215 = vmatmul.mubr.msk.bf16.vlgmr.msra.gmra.mxu0 %vm352_vm1, %v328_v3 }
  0x5a   : > { %1226 = vmatprep.mubr.msk.bf16.mxu0 %vm1610_vm0, %v1609_v0 }
 0x119   : > { %v390_v5 = vpop.f32.mrf.mxu0 }
 0x11a   : > { %v391_v6 = vadd.f32 %v1154_v4, %v390_v5 }
 0x11b   : > { %v1216_v7 = vpop.f32.mrf.mxu0 }
 0x11c   : > { %v396_v8 = vpack.c.bf16 %v391_v6, %v391_v6 }
 0x11d   : > { %v393_v9 = vpop.f32.mrf.mxu0 }
 0x11e   : > { %398 = vst.msk [vmem:[#allocation2] sm:$0xf] %vm397_vm2, %v396_v8 }
 0x11f   : > { %v1217_v10 = vpop.f32.mrf.mxu0 }
 0x125   : > { %v1383_v11 = vld [vmem:[#allocation2] ss:$0 sps:$4 sm:$0xff]  }
 0x126   : > { %v1811_v12 = vld [vmem:[#allocation2] ss:$0 sps:$4 sm:$0xff]   ;;  %526 = vrot.lane.b32.xlu1 %v1383_v11, %s1611_s29  ;;  %s1624_s29 = smov 24  }
 0x127   : > { %409 = vrot.lane.b32.xlu0 %v1811_v12, %s1612_s7  ;;  %v1814_v13 = vld [vmem:[#allocation2] ss:$0 sps:$4 sm:$0xff]   ;;  %s1187_s7 = sshll.u32 %s1594_s24, 9 }
 0x128   : > { %v1816_v14 = vld [vmem:[#allocation2] ss:$0 sps:$4 sm:$0xff]  }
 0x129   : > { %v1820_v15 = vld [vmem:[#allocation2] ss:$0 sps:$4 sm:$0xff]  }
 0x12a   : > { %652 = vrot.lane.b32.xlu1 %v1814_v13, %s1613_s9  ;;  %v1388_v16 = vld [vmem:[#allocation2] ss:$0 sps:$4 sm:$0xff]   ;;  %s1003_s9 = sshll.u32 %s1856_s19, 4  ;;  %s1894_s9 = int_to_ptr.vmem [resolvable:$true] %s1003_s9 }
 0x12b   : > { %531 = vrot.lane.b32.xlu0 %v1816_v14, %s1614_s20  ;;  %v1389_v17 = vld [vmem:[#allocation2] ss:$0 sps:$4 sm:$0xff]  }
 0x12c   : > { %v404_v22 = vld [vmem:[#allocation2] sm:$0xf] }
 0x12e   : > { %773 = vrot.lane.b32.xlu1 %v1820_v15, %s1615_s27 }
 0x12f   : > { %647 = vrot.lane.b32.xlu0 %v1388_v16, %s1616_s28  ;;  %s1892_s28 = scalar_lea.hbm %s1983_s6, %s1187_s7 }
 0x133   : > { %768 = vrot.lane.b32.xlu0 %v1389_v17, %s1617_s30  ;;  %s975_s30 = scalar_lea.sflag [#allocation11], %s1785_s15 }
 0x198   : > { %v527_v21 = vpop.permute.xlu1 %526 }
 0x199   : > { %v410_v18 = vpop.permute.xlu0 %409 }
 0x19a   : > { %v416_v19 = vsel %vm411_vm3, %v410_v18, 0 }
 0x19b   : > { %1219 = vmatpush3.bf16.xpose.msra.mxu1 %v416_v19 }
 0x19c   : > { %1230 = vmatprep.subr.bf16.mxu1 %v1609_v0  ;;  %v653_v24 = vpop.permute.xlu1 %652 }
 0x19d   : > { %v532_v20 = vpop.permute.xlu0 %531  ;;  %v658_v25 = vsel %vm411_vm3, %v653_v24, 0 }
 0x19e   : > { %v537_v23 = vsel %vm411_vm3, %v532_v20, 0 }
 0x1a0   : > { %v774_v26 = vpop.permute.xlu1 %773 }
 0x1a1   : > { %v648_v27 = vpop.permute.xlu0 %647  ;;  %v779_v28 = vsel %vm411_vm3, %v774_v26, 0 }
 0x1a2   : > { %1221 = vmatmul.mubr.msk.bf16.vlgmr.msra.gmra.mxu1 %vm411_vm3, %v404_v22 }
 0x1a3   : > { %1231 = vmatpush3.bf16.xpose.msra.mxu1 %v537_v23  ;;  %1232 = vmatprep.mubr.msk.bf16.mxu1 %vm1610_vm0, %v1609_v0 }
 0x1a4   : > { %1242 = vmatprep.subr.bf16.mxu1 %v1609_v0 }
 0x1a5   : > { %v769_v29 = vpop.permute.xlu0 %768 }
 0x1aa   : > { %1233 = vmatmul.mubr.msk.bf16.vlgmr.msra.gmra.mxu1 %vm411_vm3, %v527_v21 }
 0x1ab   : > { %1243 = vmatpush3.bf16.xpose.msra.mxu1 %v658_v25  ;;  %1244 = vmatprep.mubr.msk.bf16.mxu1 %vm1610_vm0, %v1609_v0 }
 0x1ac   : > { %1254 = vmatprep.subr.bf16.mxu1 %v1609_v0 }
 0x1b2   : > { %1245 = vmatmul.mubr.msk.bf16.vlgmr.msra.gmra.mxu1 %vm411_vm3, %v648_v27 }
 0x1b3   : > { %1255 = vmatpush3.bf16.xpose.msra.mxu1 %v779_v28  ;;  %1256 = vmatprep.mubr.msk.bf16.mxu1 %vm1610_vm0, %v1609_v0 }
 0x1b4   : > { %1266 = vmatprep.subr.bf16.mxu1 %v1609_v0 }
 0x1ba   : > { %1257 = vmatmul.mubr.msk.bf16.vlgmr.msra.gmra.mxu1 %vm411_vm3, %v769_v29 }
 0x1bb   : > { %1270 = vmatprep.mubr.msk.bf16.mxu1 %vm1610_vm0, %v1609_v0 }
 0x262   : > { %v452_v30 = vpop.f32.mrf.mxu1 }
 0x263   : > { %v458_v31 = vsel %vm411_vm3, %v452_v30, -inf }
 0x264   : > { %459 = vmax.xlane.f32.xlu1 %v458_v31  ;;  %v1222_v32 = vpop.f32.mrf.mxu1 }
 0x266   : > { %v455_v33 = vpop.f32.mrf.mxu1 }
 0x268   : > { %v1223_v34 = vpop.f32.mrf.mxu1 }
 0x26a   : > { %v573_v35 = vpop.f32.mrf.mxu1 }
 0x26b   : > { %v579_v36 = vsel %vm411_vm3, %v573_v35, -inf }
 0x26c   : > { %580 = vmax.xlane.f32.xlu0 %v579_v36  ;;  %v1234_v37 = vpop.f32.mrf.mxu1 }
 0x26e   : > { %v576_v38 = vpop.f32.mrf.mxu1 }
 0x270   : > { %v1235_v39 = vpop.f32.mrf.mxu1 }
 0x272   : > { %v694_v40 = vpop.f32.mrf.mxu1 }
 0x273   : > { %v700_v41 = vsel %vm411_vm3, %v694_v40, -inf }
 0x274   : > { %701 = vmax.xlane.f32.xlu0 %v700_v41  ;;  %v1246_v42 = vpop.f32.mrf.mxu1  ;;  %v1391_v41 = vld [vmem:[#allocation8] sm:$0xff]  }
 0x276   : > { %v697_v43 = vpop.f32.mrf.mxu1 }
 0x278   : > { %v1247_v44 = vpop.f32.mrf.mxu1 }
 0x27a   : > { %v815_v45 = vpop.f32.mrf.mxu1 }
 0x27b   : > { %v821_v46 = vsel %vm411_vm3, %v815_v45, -inf }
 0x27c   : > { %822 = vmax.xlane.f32.xlu1 %v821_v46  ;;  %v1258_v47 = vpop.f32.mrf.mxu1 }
 0x27e   : > { %v818_v48 = vpop.f32.mrf.mxu1 }
 0x280   : > { %v1259_v49 = vpop.f32.mrf.mxu1 }
 0x2ed   : > { %v460_v50 = vpop.xlane.xlu1 %459 }
 0x2ee   : > { %v461_v51 = vsub.f32 %v452_v30, %v460_v50 }
 0x2f0   : > { %v462_v52 = vmul.f32 1.442695, %v461_v51 }
 0x2f2   : > { %1392 = vpow2.f32 %v462_v52 }
 0x2f5   : > { %v581_v53 = vpop.xlane.xlu0 %580 }
 0x2f6   : > { %v582_v54 = vsub.f32 %v573_v35, %v581_v53 }
 0x2f8   : > { %v583_v55 = vmul.f32 1.442695, %v582_v54 }
 0x2fa   : > { %1394 = vpow2.f32 %v583_v55 }
 0x2fd   : > { %v702_v56 = vpop.xlane.xlu0 %701 }
 0x2fe   : > { %v703_v57 = vsub.f32 %v694_v40, %v702_v56  ;;  %v1390_v40 = vld [vmem:[#allocation8 + $0x8] sm:$0xff]  }
 0x2ff   : > { %v1393_v58 = vpop.eup %1392  ;;  %1267 = vmatpush3.bf16.msra.mxu1 %v1390_v40 }
 0x300   : > { %v704_v59 = vmul.f32 1.442695, %v703_v57  ;;  %v464_v60 = vsel %vm411_vm3, %v1393_v58, 0.0  ;;  %1268 = vmatprep.subr.bf16.mxu1 %v1609_v0 }
 0x301   : > { %465 = vadd.xlane.f32.xlu0 %v464_v60 }
 0x302   : > { %1396 = vpow2.f32 %v704_v59 }
 0x303   : > { %1269 = vmatpush3.bf16.msra.mxu1 %v1391_v41 }
 0x305   : > { %v823_v2 = vpop.xlane.xlu1 %822 }
 0x306   : > { %v824_v3 = vsub.f32 %v815_v45, %v823_v2 }
 0x307   : > { %v1395_v61 = vpop.eup %1394 }
 0x308   : > { %v585_v62 = vsel %vm411_vm3, %v1395_v61, 0.0  ;;  %v825_v4 = vmul.f32 1.442695, %v824_v3 }
 0x309   : > { %586 = vadd.xlane.f32.xlu1 %v585_v62 }
 0x30a   : > { %1398 = vpow2.f32 %v825_v4 }
 0x30f   : > { %v1397_v63 = vpop.eup %1396 }
 0x310   : > { %v706_v1 = vsel %vm411_vm3, %v1397_v63, 0.0 }
 0x311   : > { %707 = vadd.xlane.f32.xlu0 %v706_v1 }
 0x317   : > { %v1399_v5 = vpop.eup %1398 }
 0x318   : > { %v827_v6 = vsel %vm411_vm3, %v1399_v5, 0.0 }
 0x31a   : > { %593 = vrot.lane.b32.xlu1 %v1816_v14, %s1618_s13  ;;  %s1488_s13 = scalar_lea.vmem %s1894_s9, 512 }
 0x31b   : > { %p1489_p8 = scmp.ne.s32.totalorder %s1894_s9, %s1488_s13 }
 0x31d   : > { %p1490_p9 = pnand %p1489_p8, %p1758_p7 }
 0x31f   : > { %p1491_p11 = pneg %p1490_p9 }
 0x327   : > { %471 = vrot.lane.b32.xlu0 %v1811_v12, %s1619_s11  ;;  %s1625_s11 = smov [#allocation10]  }
 0x32b   : > { %835 = vrot.lane.b32.xlu0 %v1820_v15, %s1620_s16  ;;  %s1492_s16 = sshll.u32 %s1625_s11, 4  ;;  %s1493_s16 = int_to_ptr.vmem [resolvable:$false] %s1492_s16 }
 0x32c   : > { %p1495_p2 = scmp.lt.s32.totalorder %s1894_s9, %s1493_s16 }
 0x33e   : > { %828 = vadd.xlane.f32.xlu1 %v827_v6 }
 0x34f   : > { %714 = vrot.lane.b32.xlu1 %v1814_v13, %s1621_s14  ;;  %s1494_s14 = scalar_lea.vmem %s1493_s16, 1024 }
 0x350   : > { %p1496_p13 = scmp.lt.s32.totalorder %s1494_s14, %s1488_s13 }
 0x352   : > { %p1497_p0 = por %p1496_p13, %p1495_p2 }
 0x354   : > { %p1498_p5 = pnand %p1497_p0, %p1491_p11 }
 0x38a   : > { %v466_v7 = vpop.xlane.xlu0 %465 }
 0x38b   : > { %1400 = vrcp.f32 %v466_v7 }
 0x392   : > { %v587_v8 = vpop.xlane.xlu1 %586 }
 0x393   : > { %1402 = vrcp.f32 %v587_v8 }
 0x396   : > { %v594_v15 = vpop.permute.xlu1 %593 }
 0x397   : > { %v599_v18 = vsel %vm476_vm4, %v594_v15, 0 }
 0x398   : > { %v1401_v9 = vpop.eup %1400 }
 0x399   : > { %v468_v10 = vmul.f32 %v1401_v9, %v1393_v58 }
 0x39a   : > { %v708_v11 = vpop.xlane.xlu0 %707 }
 0x39b   : > { %1404 = vrcp.f32 %v708_v11  ;;  %469 = vst.msk [vmem:[%s1856_s19] sm:$0xff] %vm411_vm3, %v468_v10  ;;  %v470_v16 = vpack.c.bf16 %v468_v10, %v468_v10 }
 0x39e   : > { %v472_v12 = vpop.permute.xlu0 %471 }
 0x39f   : > { %v478_v14 = vsel %vm476_vm4, %v472_v12, 0 }
 0x3a0   : > { %v1403_v13 = vpop.eup %1402  ;;  %1225 = vmatpush3.bf16.msra.mxu0 %v478_v14 }
 0x3a1   : > { %1236 = vmatprep.subr.bf16.mxu0 %v1609_v0  ;;  %v589_v17 = vmul.f32 %v1403_v13, %v1395_v61 }
 0x3a2   : > { %v836_v25 = vpop.permute.xlu0 %835 }
 0x3a3   : > { %1227 = vmatmul.mubr.msk.bf16.vlgmr.msra.gmra.mxu0 %vm411_vm3, %v470_v16  ;;  %1164 = vst.msk [vmem:[%s1856_s19 + $0x8] sm:$0xff] %vm411_vm3, %v589_v17  ;;  %v592_v20 = vpack.c.bf16 %v589_v17, %v589_v17  ;;  %v841_v27 = vsel %vm476_vm4, %v836_v25, 0 }
 0x3a4   : > { %1237 = vmatpush3.bf16.msra.mxu0 %v599_v18  ;;  %1238 = vmatprep.mubr.msk.bf16.mxu0 %vm1610_vm0, %v1609_v0 }
 0x3a5   : > { %1248 = vmatprep.subr.bf16.mxu0 %v1609_v0 }
 0x3a8   : > { %v1405_v19 = vpop.eup %1404 }
 0x3a9   : > { %v710_v21 = vmul.f32 %v1405_v19, %v1397_v63 }
 0x3ab   : > { %1239 = vmatmul.mubr.msk.bf16.vlgmr.msra.gmra.mxu0 %vm411_vm3, %v592_v20  ;;  %1169 = vst.msk [vmem:[%s1856_s19 + $0x10] sm:$0xff] %vm411_vm3, %v710_v21  ;;  %v713_v26 = vpack.c.bf16 %v710_v21, %v710_v21 }
 0x3ac   : > { %1250 = vmatprep.mubr.msk.bf16.mxu0 %vm1610_vm0, %v1609_v0 }
 0x3c7   : > { %v829_v22 = vpop.xlane.xlu1 %828 }
 0x3c8   : > { %1406 = vrcp.f32 %v829_v22 }
 0x3cb   : > { %v715_v23 = vpop.permute.xlu1 %714 }
 0x3cc   : > { %v720_v24 = vsel %vm476_vm4, %v715_v23, 0 }
 0x3cd   : > { %1249 = vmatpush3.bf16.msra.mxu0 %v720_v24 }
 0x3ce   : > { %1260 = vmatprep.subr.bf16.mxu0 %v1609_v0 }
 0x3d0   : > { %1251 = vmatmul.mubr.msk.bf16.vlgmr.msra.gmra.mxu0 %vm411_vm3, %v713_v26 }
 0x3d1   : > { %1261 = vmatpush3.bf16.msra.mxu0 %v841_v27  ;;  %1262 = vmatprep.mubr.msk.bf16.mxu0 %vm1610_vm0, %v1609_v0 }
 0x3d5   : > { %v1407_v28 = vpop.eup %1406 }
 0x3d6   : > { %v831_v29 = vmul.f32 %v1407_v28, %v1399_v5 }
 0x3d8   : > { %1174 = vst.msk [vmem:[%s1856_s19 + $0x18] sm:$0xff] %vm411_vm3, %v831_v29  ;;  %v834_v30 = vpack.c.bf16 %v831_v29, %v831_v29 }
 0x3da   : > { %1263 = vmatmul.mubr.msk.bf16.vlgmr.msra.gmra.mxu0 %vm411_vm3, %v834_v30 }
 0x463   : > { %v514_v31 = vpop.f32.mrf.mxu0 }
 0x464   : > { %v520_v0 = vpack.c.bf16 %v514_v31, %v514_v31 }
 0x465   : > { %v1228_v32 = vpop.f32.mrf.mxu0 }
 0x467   : > { %v517_v33 = vpop.f32.mrf.mxu0 }
 0x469   : > { %v1229_v34 = vpop.f32.mrf.mxu0 }
 0x46b   : > { %v635_v35 = vpop.f32.mrf.mxu0 }
 0x46c   : > { %v641_v36 = vpack.c.bf16 %v635_v35, %v635_v35 }
 0x46d   : > { %v1240_v37 = vpop.f32.mrf.mxu0 }
 0x46e   : > { %885 = vrot.lane.b32.xlu1 %v641_v36, %s1622_s1 }
 0x46f   : > { %v638_v38 = vpop.f32.mrf.mxu0 }
 0x471   : > { %v1241_v39 = vpop.f32.mrf.mxu0 }
 0x490   : > { %v756_v42 = vpop.f32.mrf.mxu0 }
 0x491   : > { %v762_v43 = vpack.c.bf16 %v756_v42, %v756_v42 }
 0x492   : > { %v1252_v44 = vpop.f32.mrf.mxu0 }
 0x493   : > { %888 = vrot.lane.b32.xlu0 %v762_v43, %s1623_s3 }
 0x494   : > { %v759_v45 = vpop.f32.mrf.mxu0 }
 0x496   : > { %v1253_v46 = vpop.f32.mrf.mxu0 }
 0x49a   : > { %v877_v47 = vpop.f32.mrf.mxu0 }
 0x49b   : > { %v883_v48 = vpack.c.bf16 %v877_v47, %v877_v47 }
 0x49c   : > { %v1264_v49 = vpop.f32.mrf.mxu0 }
 0x49d   : > { %891 = vrot.lane.b32.xlu1 %v883_v48, %s1624_s29 }
 0x49e   : > { %v880_v50 = vpop.f32.mrf.mxu0 }
 0x4a0   : > { %v1265_v51 = vpop.f32.mrf.mxu0 }
 0x4e0   : > { %v886_v52 = vpop.permute.xlu1 %885 }
 0x4e1   : > { %v895_v54 = vsel %vm411_vm3, %v520_v0, %v886_v52 }
 0x505   : > { %v889_v53 = vpop.permute.xlu0 %888 }
 0x506   : > { %v898_v55 = vsel %vm896_vm5, %v895_v54, %v889_v53 }
 0x50f   : > { %v892_v56 = vpop.permute.xlu1 %891 }
 0x510   : > { %v901_v57 = vsel %vm899_vm6, %v898_v55, %v892_v56 }
 0x511   : > { %1271 = vmatmul.mubr.msk.bf16.vlgmr.msra.gmra.mxu1 %vm352_vm1, %v901_v57 }
 0x512   : > { %1501 = shalt.err (!%p1498_p5)
}
 0x513   : > { %s1502_s18 = scalar_lea.hbm %s1892_s28, 512  ;;  %s1506_s29 = scalar_lea.hbm %s1983_s6, 1024 }
 0x514   : > { %p1503_p10 = scmp.ne.s32.totalorder %s1892_s28, %s1502_s18  ;;  %p1507_p6 = scmp.lt.s32.totalorder %s1892_s28, %s1983_s6 }
 0x515   : > { %p1508_p12 = scmp.lt.s32.totalorder %s1506_s29, %s1502_s18 }
 0x516   : > { %p1504_p1 = pnand %p1503_p10, %p1758_p7 }
 0x517   : > { %p1509_p3 = por %p1508_p12, %p1507_p6 }
 0x518   : > { %p1505_p4 = pneg %p1504_p1 }
 0x51a   : > { %p1510_p8 = pnand %p1509_p3, %p1505_p4 }
 0x51c   : > { %1513 = shalt.err (!%p1510_p8)
}
 0x51d   : > { %s1626_s27 = smov 128   ;;  %s1152_s13 = sshll.u32 %s1785_s15, 3  ;;  %v1176_v58 = vld [vmem:[%s1981_s4] ss:$0 sm:$0xff] }
 0x51e   : > { %1285 = dma.vmem_to_hbm [thread:$0]  (%p1758_p7), %s1894_s9, 512, %s1892_s28, %s975_s30, %s1626_s27, %s1626_s27, %s1622_s1  }
 0x51f   : > { %s1182_s14 = sshll.u32 %s1594_s24, 7  ;;  %s315_s18 = scalar_lea.vmem [#allocation9], %s1152_s13 }
 0x520   : > { %s989_s19 = sshll.u32 %s315_s18, 4  ;;  %s1928_s7 = scalar_lea.hbm %s1982_s5, %s1182_s14  ;;  %s1930_s19 = int_to_ptr.vmem [resolvable:$true] %s989_s19 }
 0x521   : > { %s970_s1 = scalar_lea.sflag [#allocation5], %s1785_s15  ;;  %s1514_s24 = scalar_lea.vmem %s1930_s19, 128 }
 0x522   : > { %p1515_p9 = scmp.ne.s32.totalorder %s1930_s19, %s1514_s24  ;;  %s1627_s9 = smov [#allocation9]  }
 0x523   : > { %s1518_s28 = sshll.u32 %s1627_s9, 4  ;;  %s1519_s28 = int_to_ptr.vmem [resolvable:$false] %s1518_s28 }
 0x524   : > { %p1516_p11 = pnand %p1515_p9, %p1758_p7  ;;  %s1520_s30 = scalar_lea.vmem %s1519_s28, 256 }
 0x525   : > { %p1521_p13 = scmp.lt.s32.totalorder %s1930_s19, %s1519_s28  ;;  %p1522_p0 = scmp.lt.s32.totalorder %s1520_s30, %s1514_s24 }
 0x526   : > { %p1517_p2 = pneg %p1516_p11 }
 0x527   : > { %p1523_p5 = por %p1522_p0, %p1521_p13 }
 0x529   : > { %p1524_p10 = pnand %p1523_p5, %p1517_p2 }
 0x5d1   : > { %v962_v59 = vpop.f32.mrf.mxu1 }
 0x5d2   : > { %v963_v60 = vadd.f32 %v1176_v58, %v962_v59 }
 0x5d3   : > { %v1272_v61 = vpop.f32.mrf.mxu1 }
 0x5d4   : > { %968 = vst.msk [vmem:[%s315_s18] sm:$0xff] %vm352_vm1, %v963_v60 }
 0x5d5   : > { %v965_v62 = vpop.f32.mrf.mxu1 }
 0x5d6   : > { %1527 = shalt.err (!%p1524_p10)
}
 0x5d7   : > { %s1528_s20 = scalar_lea.hbm %s1928_s7, 128  ;;  %s1532_s13 = scalar_lea.hbm %s1982_s5, 256 }
 0x5d8   : > { %p1529_p1 = scmp.ne.s32.totalorder %s1928_s7, %s1528_s20  ;;  %p1533_p12 = scmp.lt.s32.totalorder %s1928_s7, %s1982_s5 }
 0x5d9   : > { %p1534_p3 = scmp.lt.s32.totalorder %s1532_s13, %s1528_s20 }
 0x5da   : > { %p1530_p4 = pnand %p1529_p1, %p1758_p7 }
 0x5db   : > { %p1535_p8 = por %p1534_p3, %p1533_p12 }
 0x5dc   : > { %p1531_p6 = pneg %p1530_p4 }
 0x5de   : > { %p1536_p9 = pnand %p1535_p8, %p1531_p6 }
 0x5e0   : > { %1539 = shalt.err (!%p1536_p9)
}
 0x5e1   : > { %1284 = dma.vmem_to_hbm [thread:$0]  (%p1758_p7), %s1930_s19, 128, %s1928_s7, %s970_s1   ;;  %v1273_v63 = vpop.f32.mrf.mxu1 }
 0x5e2 PF: > { %s1018_s14 = sand.u32 1, %s1582_s21   ;;  %p2001_p11 = scmp.ne.s32.totalorder %s1992_s8, 0 }
 0x5e3   : > { %p2002_p2 = scmp.ge.s32.totalorder %s1602_s26, 2  ;;  %s1019_s18 = scalar_lea.sflag [#allocation5], %s1018_s14 }
 0x5e5   : > { %p1300_p13 = pnand %p2002_p2, %p2001_p11 }
 0x5e7   : > { %p1301_p0 = pneg %p1300_p13 }
 0x5e9   : > { %1573 = dma.done.wait (%p1301_p0), %s1019_s18, 128  }
 0x5ea   : > { %1575 = vsyncadd (%p1301_p0), %s1019_s18, 4294967168  ;;  %s1028_s3 = scalar_lea.sflag [#allocation11], %s1018_s14 }
 0x5eb   : > { %1577 = dma.done.wait (%p1301_p0), %s1028_s3, 512  }
 0x5ec   : > { %1579 = vsyncadd (%p1301_p0), %s1028_s3, 4294966784  ;;  %s27_s26 = sadd.s32 1, %s1602_s26   ;;  %s2003_s21 = smov %s1586_s22 }
 0x5ed   : > { %p24_p5 = scmp.ge.s32.totalorder %s27_s26, 4   ;;  %s2004_s22 = smov %s1590_s23 }
 0x5ee   : > { %s2005_s23 = smov %s1767_s17  ;;  %s2006_s24 = smov %s1598_s25 }
 0x5ef   : > { %s2007_s25 = smov %s2009_s10  ;;  %26 = sbr.rel (!%p24_p5) target bundleno = 12 (0xc), region = 118 }
 0x5f4   :  { %1033 = vsyncpa [#allocation4], 1 }
 0x5f5   :  { %1035 = vsyncpa [#allocation4 + $0x1], 1 }
 0x5f6   :  { %1036 = vsyncpa [#allocation7], 1 }
 0x5f7   :  { %1037 = vsyncpa [#allocation5], 1 }
 0x5f8   :  { %1039 = vsyncpa [#allocation5 + $0x1], 1 }
 0x5f9   :  { %1040 = vsyncpa [#allocation11], 1 }
 0x5fa   :  { %1042 = vsyncpa [#allocation11 + $0x1], 1 }

</bundles_post_ra>
